<compile_context>
chip_gen: v7x
topology: tpu7x:2x2x1
jax: 0.10.0
libtpu: 0.0.40
codegen_flags: <defaults>
</compile_context>

<pallas_src>
import functools
import math

import jax
import jax.numpy as jnp
from jax.experimental import pallas as pl
from jax.experimental.pallas import tpu as pltpu


def make_positional_encoding(max_len: int, d_model: int, dtype=jnp.float32):
    """Deterministic sinusoidal PE buffer, identical to the PyTorch __init__."""
    if d_model % 2 != 0:
        raise ValueError("d_model must be even (same limitation as the PyTorch module)")
    position = jnp.arange(max_len, dtype=jnp.float32)[:, None]            # (max_len, 1)
    div_term = jnp.exp(
        jnp.arange(0, d_model, 2, dtype=jnp.float32) * (-math.log(10000.0) / d_model)
    )                                                                      # (d_model/2,)
    pe = jnp.zeros((max_len, d_model), dtype=jnp.float32)
    pe = pe.at[:, 0::2].set(jnp.sin(position * div_term))
    pe = pe.at[:, 1::2].set(jnp.cos(position * div_term))
    # unsqueeze(0).transpose(0, 1) in torch -> (max_len, 1, d_model)
    return pe[:, None, :].astype(dtype)


# --------------------------------------------------------------------------- #
# Kernels
# --------------------------------------------------------------------------- #
def _pe_add_flat_kernel(x_ref, pe_ref, o_ref, *, batch):
    # Lane-dense path. x_ref/o_ref: (TS, B*D); pe_ref: (TS, D).
    # Tile pe across the B lane replicas once per block so the add and the
    # store run on full, unmasked vregs (the big measured lever here).
    o_ref[...] = x_ref[...] + jnp.tile(pe_ref[...], (1, batch))


def _pe_add_3d_kernel(x_ref, pe_ref, o_ref):
    # Fallback path. x_ref/o_ref: (TS, B, D); pe_ref: (TS, 1, D) broadcasts over batch.
    o_ref[...] = x_ref[...] + pe_ref[...]


# --------------------------------------------------------------------------- #
# Wrapper
# --------------------------------------------------------------------------- #
# ~2 MiB x-blocks: pipelines near HBM roofline, and 2x(x + pe + out) buffers
# stay far under v7x's 32 MiB scoped-VMEM default (64 MiB physical).
_TARGET_BLOCK_BYTES = 2 * 1024 * 1024


def _pick_seq_tile(seq_len: int, row_bytes: int, target_bytes: int) -> int:
    """Largest sequence tile keeping an x block around `target_bytes`.

    Returns seq_len itself if everything already fits in one block; otherwise
    a multiple of 8 (second-to-last-dim rule when the tile doesn't span the
    full sequence axis).
    """
    if seq_len * row_bytes <= target_bytes:
        return seq_len
    ts = (target_bytes // row_bytes) // 8 * 8
    return int(max(8, min(seq_len, ts)))


def positional_encoding_forward(x, pe, *, block_bytes=_TARGET_BLOCK_BYTES):
    """x: (S, B, D); pe: (max_len, 1, D). Returns x + pe[:S] (dropout = eval identity)."""
    S, B, D = x.shape
    if S > pe.shape[0]:
        raise ValueError(f"seq_len {S} exceeds max_len {pe.shape[0]}")

    row_bytes = B * D * x.dtype.itemsize
    ts = _pick_seq_tile(S, row_bytes, block_bytes)
    grid = (pl.cdiv(S, ts),)
    cparams = pltpu.CompilerParams(dimension_semantics=("parallel",))

    if (B * D) % 128 == 0:
        # Lane-dense layout: fold (B, D) into one >=128-wide lane axis.
        # pe stays (S, D) in HBM (no B-fold traffic blowup); the in-kernel
        # tile is cheap XLU/VPU work that rides under the DMA.
        pe_s = pe[:S, 0, :].astype(x.dtype)                  # (S, D)
        out_flat = pl.pallas_call(
            functools.partial(_pe_add_flat_kernel, batch=B),
            out_shape=jax.ShapeDtypeStruct((S, B * D), x.dtype),
            grid=grid,
            in_specs=[
                pl.BlockSpec((ts, B * D), lambda i: (i, 0)),
                pl.BlockSpec((ts, D), lambda i: (i, 0)),
            ],
            out_specs=pl.BlockSpec((ts, B * D), lambda i: (i, 0)),
            compiler_params=cparams,
        )(x.reshape(S, B * D), pe_s)
        out = out_flat.reshape(S, B, D)
    else:
        # General fallback: keep (S, B, D); pe block (TS, 1, D) broadcasts over batch.
        pe_s = pe[:S].astype(x.dtype)                        # (S, 1, D)
        out = pl.pallas_call(
            _pe_add_3d_kernel,
            out_shape=jax.ShapeDtypeStruct((S, B, D), x.dtype),
            grid=grid,
            in_specs=[
                pl.BlockSpec((ts, B, D), lambda i: (i, 0, 0)),
                pl.BlockSpec((ts, 1, D), lambda i: (i, 0, 0)),
            ],
            out_specs=pl.BlockSpec((ts, B, D), lambda i: (i, 0, 0)),
            compiler_params=cparams,
        )(x, pe_s)

    # TODO(synk): training-mode dropout(p=0.1) should be fused here in-kernel
    # (saves a full extra HBM round trip on the train path).
    return out


if __name__ == "__main__":
    key = jax.random.PRNGKey(0)
    max_len = 64
    d_model = 32
    pe = make_positional_encoding(max_len, d_model, dtype=jnp.float32)

    # 1) Lane-dense path: batch * d_model = 128 -> single full-lane axis.
    seq_len, batch = 8, 4
    x = jax.random.normal(key, (seq_len, batch, d_model), dtype=jnp.float32)
    out = jax.block_until_ready(positional_encoding_forward(x, pe))
    ref = x + pe[:seq_len]
    assert out.shape == (seq_len, batch, d_model)
    assert jnp.allclose(out, ref, atol=1e-6, rtol=1e-6)

    # 2) Fallback path: batch * d_model = 64 (not a lane multiple).
    x2 = jax.random.normal(jax.random.PRNGKey(1), (seq_len, 2, d_model), dtype=jnp.float32)
    out2 = jax.block_until_ready(positional_encoding_forward(x2, pe))
    assert jnp.allclose(out2, x2 + pe[:seq_len], atol=1e-6, rtol=1e-6)

    # 3) Multi-block pipelined path: tiny block budget forces grid=(4,) tiling.
    x3 = jax.random.normal(jax.random.PRNGKey(2), (32, 4, d_model), dtype=jnp.float32)
    out3 = jax.block_until_ready(positional_encoding_forward(x3, pe, block_bytes=4096))
    assert jnp.allclose(out3, x3 + pe[:32], atol=1e-6, rtol=1e-6)

    print("KERNEL_OK")
</pallas_src>

<mosaic_0001>
module attributes {stable_mosaic.version = 11 : i64} {
  func.func @_pe_add_flat_kernel(%arg0: i32, %arg1: memref<8x128xf32, #tpu.memory_space<vmem>>, %arg2: memref<8x32xf32, #tpu.memory_space<vmem>>, %arg3: memref<8x128xf32, #tpu.memory_space<vmem>>) attributes {dimension_semantics = [#tpu.dimension_semantics<parallel>], iteration_bounds = array<i64: 1>, scalar_prefetch = 0 : i64, scratch_operands = 0 : i64, tpu.core_type = #tpu.core_type<tc>, window_params = [{transform_indices = @transform_0, window_bounds = array<i64: 8, 128>}, {transform_indices = @transform_1, window_bounds = array<i64: 8, 32>}, {transform_indices = @transform_2, window_bounds = array<i64: 8, 128>}]} {
    %c0 = arith.constant 0 : index
    %c0_0 = arith.constant 0 : index
    %0 = vector.load %arg1[%c0, %c0_0] : memref<8x128xf32, #tpu.memory_space<vmem>>, vector<8x128xf32>
    %c0_1 = arith.constant 0 : index
    %c0_2 = arith.constant 0 : index
    %1 = vector.load %arg2[%c0_1, %c0_2] : memref<8x32xf32, #tpu.memory_space<vmem>>, vector<8x32xf32>
    %2 = tpu.concatenate %1, %1, %1, %1 in 1 : vector<8x32xf32>, vector<8x32xf32>, vector<8x32xf32>, vector<8x32xf32> -> vector<8x128xf32>
    %3 = arith.addf %0, %2 : vector<8x128xf32>
    %c0_3 = arith.constant 0 : index
    %c0_4 = arith.constant 0 : index
    %4 = vector.load %arg3[%c0_3, %c0_4] : memref<8x128xf32, #tpu.memory_space<vmem>>, vector<8x128xf32>
    tpu.vector_store %arg3[%c0_3, %c0_4], %3 {strides = array<i32>} : memref<8x128xf32, #tpu.memory_space<vmem>>, vector<8x128xf32>,
    return
  }
  func.func @transform_0(%arg0: i32) -> (i32, i32) {
    %c0_i32 = arith.constant 0 : i32
    %c0_i32_0 = arith.constant 0 : i32
    return %arg0, %c0_i32 : i32, i32
  }
  func.func @transform_1(%arg0: i32) -> (i32, i32) {
    %c0_i32 = arith.constant 0 : i32
    %c0_i32_0 = arith.constant 0 : i32
    return %arg0, %c0_i32 : i32, i32
  }
  func.func @transform_2(%arg0: i32) -> (i32, i32) {
    %c0_i32 = arith.constant 0 : i32
    %c0_i32_0 = arith.constant 0 : i32
    return %arg0, %c0_i32 : i32, i32
  }
}

</mosaic_0001>

<bundles_post_ra>
// kernel: tpu_custom_call.1
= control target key start
LH: loop header
LB: loop body
LE: loop exit
PB: predicated region body
PF: predicated region fallthrough
CT: control target
= control target key end

     0   :  { %7 = vsyncpa [#allocation3], 0  ;;  %s207_s0 = inlined_call_operand.hbm [shape: f32[8,128], index: 0, kind: input, shape index: {}]   ;;  %s208_s1 = inlined_call_operand.hbm [shape: f32[8,32], index: 1, kind: input, shape index: {}]   ;;  %s209_s2 = inlined_call_operand.hbm [shape: f32[8,128], index: 2, kind: output, shape index: {}]  }
   0x1   :  { %8 = vsyncpa [#allocation6], 0 }
   0x2   :  { %9 = vsyncpa [#allocation4], 0  ;;  %s150_s9 = smov [#allocation2]   ;;  %s151_s11 = smov [#allocation5]  }
   0x3   :  { %s16_s10 = sshll.u32 %s150_s9, 4  ;;  %s26_s12 = sshll.u32 %s151_s11, 4  ;;  %s17_s10 = int_to_ptr.vmem [resolvable:$true] %s16_s10  ;;  %s27_s12 = int_to_ptr.vmem [resolvable:$true] %s26_s12 }
   0x4   :  { %s78_s15 = scalar_lea.hbm %s207_s0, 128 }
   0x5   :  { %p79_p0 = scmp.ne.s32.totalorder %s207_s0, %s78_s15  ;;  %p82_p1 = scmp.lt.u32.totalorder %s78_s15, %s207_s0 }
   0x7   :  { %p84_p2 = pnand %p82_p1, %p79_p0 }
   0x9   :  { %87 = shalt.err (!%p84_p2)
}
   0xa   :  { %s88_s20 = scalar_lea.vmem %s17_s10, 128  ;;  %p93_p4 = scmp.lt.s32.totalorder %s17_s10, %s17_s10 }
   0xb   :  { %p89_p3 = scmp.ne.s32.totalorder %s17_s10, %s88_s20  ;;  %p94_p5 = scmp.lt.s32.totalorder %s88_s20, %s88_s20 }
   0xd   :  { %p95_p6 = por %p94_p5, %p93_p4 }
   0xf   :  { %p96_p7 = pnand %p95_p6, %p89_p3 }
  0x11   :  { %99 = shalt.err (!%p96_p7)
}
  0x12   :  { %19 = dma.hbm_to_vmem [thread:$0]  %s207_s0, 128, %s17_s10, [#allocation3]  }
  0x13   :  { %s100_s25 = scalar_lea.hbm %s208_s1, 128 }
  0x14   :  { %p101_p8 = scmp.ne.s32.totalorder %s208_s1, %s100_s25  ;;  %p104_p9 = scmp.lt.u32.totalorder %s100_s25, %s208_s1 }
  0x16   :  { %p106_p10 = pnand %p104_p9, %p101_p8 }
  0x18   :  { %109 = shalt.err (!%p106_p10)
}
  0x19   :  { %s110_s30 = scalar_lea.vmem %s27_s12, 128  ;;  %p115_p12 = scmp.lt.s32.totalorder %s27_s12, %s27_s12 }
  0x1a   :  { %p111_p11 = scmp.ne.s32.totalorder %s27_s12, %s110_s30  ;;  %p116_p13 = scmp.lt.s32.totalorder %s110_s30, %s110_s30 }
  0x1c   :  { %p117_p0 = por %p116_p13, %p115_p12 }
  0x1e   :  { %p118_p1 = pnand %p117_p0, %p111_p11 }
  0x20   :  { %121 = shalt.err (!%p118_p1)
}
  0x21   :  { %29 = dma.hbm_to_vmem [thread:$0]  %s208_s1, 128, %s27_s12, [#allocation6]  }
  0x22   :  { %144 = dma.done.wait [#allocation3], 128  }
  0x23   :  { %145 = vsyncadd [#allocation3], 4294967168 }
  0x24   :  { %146 = dma.done.wait [#allocation6], 128  }
  0x25   :  { %147 = vsyncadd [#allocation6], 4294967168  ;;  %v37_v0 = vld [vmem:[#allocation5] sm:$0xff]  ;;  %s152_s4 = smov 32   ;;  %s153_s5 = smov 96   ;;  %vm48_vm0 = vcmask 261120  }
  0x26   :  { %39 = vrot.lane.b32.xlu0 %v37_v0, %s152_s4  ;;  %45 = vrot.lane.b32.xlu1 %v37_v0, %s153_s5  ;;  %s154_s6 = smov 64   ;;  %vm50_vm1 = vcmask 523264   ;;  %vm52_vm2 = vcmask 785408   ;;  %v36_v5 = vld [vmem:[#allocation2] sm:$0xff]  ;;  %s155_s1 = smov [#allocation7]  }
  0x27   :  { %s62_s7 = sshll.u32 %s155_s1, 4  ;;  %s63_s7 = int_to_ptr.vmem [resolvable:$true] %s62_s7 }
  0x28   :  { %s122_s8 = scalar_lea.vmem %s63_s7, 128  ;;  %p127_p3 = scmp.lt.s32.totalorder %s63_s7, %s63_s7 }
  0x29   :  { %p123_p2 = scmp.ne.s32.totalorder %s63_s7, %s122_s8  ;;  %p128_p4 = scmp.lt.s32.totalorder %s122_s8, %s122_s8 }
  0x2a   :  { %42 = vrot.lane.b32.xlu0 %v37_v0, %s154_s6 }
  0x2b   :  { %p129_p5 = por %p128_p4, %p127_p3 }
  0x2d   :  { %p130_p6 = pnand %p129_p5, %p123_p2 }
  0x98   :  { %v40_v1 = vpop.permute.xlu0 %39  ;;  %v46_v2 = vpop.permute.xlu1 %45 }
  0x99   :  { %v49_v3 = vsel %vm48_vm0, %v37_v0, %v40_v1 }
  0x9c   :  { %v43_v4 = vpop.permute.xlu0 %42 }
  0x9d   :  { %v51_v6 = vsel %vm50_vm1, %v49_v3, %v43_v4 }
  0x9e   :  { %v53_v7 = vsel %vm52_vm2, %v51_v6, %v46_v2 }
  0x9f   :  { %v54_v8 = vadd.f32 %v53_v7, %v36_v5 }
  0xa1   :  { %55 = vst [vmem:[#allocation7] sm:$0xff] %v54_v8 }
  0xa2   :  { %133 = shalt.err (!%p130_p6)
}
  0xa3   :  { %s134_s11 = scalar_lea.hbm %s209_s2, 128 }
  0xa4   :  { %p135_p7 = scmp.ne.s32.totalorder %s209_s2, %s134_s11  ;;  %p138_p8 = scmp.lt.u32.totalorder %s134_s11, %s209_s2 }
  0xa6   :  { %p140_p9 = pnand %p138_p8, %p135_p7 }
  0xa8   :  { %143 = shalt.err (!%p140_p9)
}
  0xa9   :  { %65 = dma.vmem_to_hbm [thread:$0]  %s63_s7, 128, %s209_s2, [#allocation4]  }
  0xaa   :  { %148 = dma.done.wait [#allocation4], 128  }
  0xab   :  { %149 = vsyncadd [#allocation4], 4294967168 }
  0xac   :  { %69 = vsyncpa [#allocation3], 1 }
  0xad   :  { %70 = vsyncpa [#allocation6], 1 }
  0xae   :  { %71 = vsyncpa [#allocation4], 1 }

</bundles_post_ra>
